<compile_context>
chip_gen: v7x
topology: tpu7x:2x2x1
jax: 0.10.0
libtpu: 0.0.40
codegen_flags: <defaults>
</compile_context>

<pallas_src>
import jax
import jax.numpy as jnp
import numpy as np
from jax import lax
from jax.experimental import pallas as pl
from jax.experimental.pallas import tpu as pltpu


def _round_up(x: int, m: int) -> int:
    return ((x + m - 1) // m) * m


def _cdiv(a: int, b: int) -> int:
    return -(-a // b)


def _prefers_f32_compute() -> bool:
    """bf16 VALU exists on v6e/v7x; keep an explicit f32 upcast on older gens."""
    try:
        kind = jax.devices()[0].device_kind.lower()
    except Exception:
        return True
    return not any(g in kind for g in ("v6", "v7"))


def _choose_tiling(S: int, ch: int = 128, ts_cap: int = 4096):
    """Pick (TS, CH): TS rows per DMA tile (multiple of CH), CH rows per
    in-kernel compute chunk.  Large TS amortises grid-step overhead; sequences
    long enough get >= 2 tiles so the parallel axis feeds both v7x cores."""
    S8 = _round_up(max(S, 1), 8)
    if S8 <= ch:
        return S8, S8                           # one small tile, one chunk
    ts = min(ts_cap, _round_up(_cdiv(S8, 2), ch))
    return ts, ch


def _make_kernel(CH: int, n_chunks: int, upcast: bool):
    """Per-tile kernel for a (TS, L) logits tile, TS = CH * n_chunks."""

    def kernel(prev_best_ref, x_ref, out_ref):
        # prev_best_ref : SMEM int32[...] (scalar prefetch); prev_best_ref[i-1]
        #                 is the best label just before tile i.
        # x_ref         : (TS, L) logits tile, native dtype.
        # out_ref       : (TS, 1) int32 packed as best + (keep << 16).
        pid = pl.program_id(0)
        L = x_ref.shape[1]

        # Carry into this tile's first timestep: -1 ("no predecessor", always
        # keep) for tile 0, else the prefetched boundary best of the previous
        # tile.  Keeps tiles independent -> safe to mark the axis "parallel".
        tile_carry = jnp.where(pid == 0, jnp.int32(-1),
                               prev_best_ref[jnp.maximum(pid - 1, 0)])

        def process_chunk(c, carry):
            start = c * CH
            if not isinstance(start, int):
                start = pl.multiple_of(start, CH)
            x = x_ref[pl.ds(start, CH), :]                    # (CH, L)
            if upcast:                                        # v5e/v4 only
                x = x.astype(jnp.float32)

            # argmax over the label (lane) axis, first-max tie-break.
            m = jnp.max(x, axis=-1, keepdims=True)            # (CH, 1)
            col = lax.broadcasted_iota(jnp.int32, (CH, L), 1)
            cand = jnp.where(x == m, col, jnp.int32(L))
            best = jnp.min(cand, axis=-1, keepdims=True)      # (CH, 1) int32
            best = jnp.minimum(best, jnp.int32(L - 1))        # NaN / garbage guard

            # unique_consecutive keep mask: compare with the previous timestep.
            prev = pltpu.roll(best, shift=1, axis=0)          # prev[t] = best[t-1]
            sub = lax.broadcasted_iota(jnp.int32, (CH, 1), 0)
            prev = jnp.where(sub == 0, carry, prev)           # chunk/tile seam
            keep = (best != prev).astype(jnp.int32)

            out_ref[pl.ds(start, CH), :] = best + keep * jnp.int32(1 << 16)
            return best

        if n_chunks == 1:
            process_chunk(0, tile_carry)
        else:
            def chunk_step(c, carry):
                best = process_chunk(c, carry)
                return best[CH - 1, 0]                        # carry to next chunk
            lax.fori_loop(0, n_chunks, chunk_step, tile_carry, unroll=True)

    return kernel


def greedy_decode_packed(logits: jax.Array) -> jax.Array:
    """Greedy CTC decode of (S, L) logits.
    Returns int32[S, 1] with packed[t, 0] = best_label_t + (keep_t << 16)."""
    S, L = logits.shape
    assert L < (1 << 16), "label count must fit in 16 bits for packing"

    TS, CH = _choose_tiling(S)
    num_tiles = _cdiv(S, TS)
    n_chunks = TS // CH

    # Boundary carry: best label of the last timestep of every tile but the
    # last.  Contiguous row reads from the native (S, L) layout, and the SAME
    # scheme as the kernel so tie-break / NaN behaviour match at tile seams.
    if num_tiles > 1:
        rows = logits[TS - 1:(num_tiles - 1) * TS:TS, :]      # (num_tiles-1, L)
        m = jnp.max(rows, axis=-1, keepdims=True)
        col = jnp.arange(L, dtype=jnp.int32)[None, :]
        cand = jnp.where(rows == m, col, jnp.int32(L))
        boundary_best = jnp.minimum(jnp.min(cand, axis=-1),
                                    L - 1).astype(jnp.int32)
    else:
        boundary_best = jnp.zeros((1,), jnp.int32)

    kernel = _make_kernel(CH, n_chunks, upcast=_prefers_f32_compute())
    grid_spec = pltpu.PrefetchScalarGridSpec(
        num_scalar_prefetch=1,
        grid=(num_tiles,),
        # Default double-buffering is enough: per-tile input is only L*TS*2 B.
        in_specs=[pl.BlockSpec((TS, L), lambda i, bb: (i, 0))],
        out_specs=pl.BlockSpec((TS, 1), lambda i, bb: (i, 0)),
    )
    packed = pl.pallas_call(
        kernel,
        out_shape=jax.ShapeDtypeStruct((S, 1), jnp.int32),
        grid_spec=grid_spec,
        compiler_params=pltpu.CompilerParams(
            dimension_semantics=("parallel",),     # shard tiles across TCs on v7x
            vmem_limit_bytes=32 * 1024 * 1024,     # tiny tiles; safe on v7x 64 MiB
        ),
    )(boundary_best, logits)
    return packed


def decode_to_string(logits: jax.Array, labels) -> str:
    packed = greedy_decode_packed(logits)
    packed = np.asarray(jax.block_until_ready(packed))[:, 0]
    best = (packed & 0xFFFF).astype(np.int64)
    keep = ((packed >> 16) & 1).astype(bool)
    # TODO(synk): string assembly / label-table lookup is inherently host Python.
    hypothesis = ""
    for idx in best[keep]:
        char = labels[int(idx)]
        if char in ("<s>", "<pad>"):
            continue
        if char == "|":
            char = " "
        hypothesis += char
    return hypothesis


def reference_decode(logits_np: np.ndarray, labels) -> str:
    best_path = np.argmax(logits_np, axis=-1)
    collapsed = [best_path[0]]
    for v in best_path[1:]:
        if v != collapsed[-1]:
            collapsed.append(v)
    hyp = ""
    for i in collapsed:
        char = labels[int(i)]
        if char in ["<s>", "<pad>"]:
            continue
        if char == "|":
            char = " "
        hyp += char
    return hyp


if __name__ == "__main__":
    num_seq, num_label = 8, 32
    labels = ["<s>", "<pad>", "|"] + list("abcdefghijklmnopqrstuvwxyz") + ["'", "-", "."]
    assert len(labels) == num_label

    key = jax.random.PRNGKey(0)
    logits_f32 = jax.random.normal(key, (num_seq, num_label), dtype=jnp.float32)
    # HBM-bound decoder -> feed bf16 to halve the single HBM read; the reference
    # is computed from the same bf16 values so results match exactly.
    logits = logits_f32.astype(jnp.bfloat16)

    hyp = decode_to_string(logits, labels)
    ref = reference_decode(np.asarray(logits).astype(np.float32), labels)
    assert hyp == ref, f"mismatch: kernel={hyp!r} ref={ref!r}"
    print("KERNEL_OK")
</pallas_src>

<mosaic_0001>
module attributes {stable_mosaic.version = 11 : i64} {
  func.func @kernel(%arg0: i32, %arg1: memref<1xi32, #tpu.memory_space<smem>>, %arg2: memref<8x32xbf16, #tpu.memory_space<vmem>>, %arg3: memref<8x1xi32, #tpu.memory_space<vmem>>) attributes {dimension_semantics = [#tpu.dimension_semantics<parallel>], iteration_bounds = array<i64: 1>, scalar_prefetch = 1 : i64, scratch_operands = 0 : i64, tpu.core_type = #tpu.core_type<tc>, window_params = [{transform_indices = @transform_0, window_bounds = array<i64: 8, 32>}, {transform_indices = @transform_1, window_bounds = array<i64: 8, 1>}]} {
    %c0_i32 = arith.constant 0 : i32
    %0 = arith.cmpi eq, %arg0, %c0_i32 : i32
    %c1_i32 = arith.constant 1 : i32
    %1 = arith.subi %arg0, %c1_i32 : i32
    %c0_i32_0 = arith.constant 0 : i32
    %2 = arith.maxsi %1, %c0_i32_0 : i32
    %3 = arith.index_cast %2 : i32 to index
    %4 = memref.load %arg1[%3] : memref<1xi32, #tpu.memory_space<smem>>
    %c-1_i32 = arith.constant -1 : i32
    %5 = arith.select %0, %c-1_i32, %4 : i32
    %c0 = arith.constant 0 : index
    %c0_1 = arith.constant 0 : index
    %6 = vector.load %arg2[%c0, %c0_1] : memref<8x32xbf16, #tpu.memory_space<vmem>>, vector<8x32xbf16>
    %7 = arith.extf %6 : vector<8x32xbf16> to vector<8x32xf32>
    %cst = arith.constant dense<0xFF800000> : vector<8xf32>
    %8 = vector.multi_reduction <maximumf>, %7, %cst [1] : vector<8x32xf32> to vector<8xf32>
    %9 = vector.shape_cast %8 : vector<8xf32> to vector<8x1xf32>
    %10 = tpu.iota {dimensions = array<i32: 1>} : vector<8x32xi32>
    %11 = vector.broadcast %9 : vector<8x1xf32> to vector<8x32xf32>
    %12 = arith.cmpf oeq, %7, %11 : vector<8x32xf32>
    %c32_i32 = arith.constant 32 : i32
    %13 = vector.broadcast %c32_i32 : i32 to vector<8x32xi32>
    %14 = arith.select %12, %10, %13 : vector<8x32xi1>, vector<8x32xi32>
    %cst_2 = arith.constant dense<2147483647> : vector<8xi32>
    %15 = vector.multi_reduction <minsi>, %14, %cst_2 [1] : vector<8x32xi32> to vector<8xi32>
    %16 = vector.shape_cast %15 : vector<8xi32> to vector<8x1xi32>
    %c31_i32 = arith.constant 31 : i32
    %17 = vector.broadcast %c31_i32 : i32 to vector<8x1xi32>
    %18 = arith.minsi %16, %17 : vector<8x1xi32>
    %c1_i32_3 = arith.constant 1 : i32
    %19 = tpu.dynamic_rotate %18 by %c1_i32_3 dim 0 : vector<8x1xi32>, i32 -> vector<8x1xi32>
    %20 = tpu.iota {dimensions = array<i32: 0>} : vector<8x1xi32>
    %c0_i32_4 = arith.constant 0 : i32
    %21 = vector.broadcast %c0_i32_4 : i32 to vector<8x1xi32>
    %22 = arith.cmpi eq, %20, %21 : vector<8x1xi32>
    %23 = vector.broadcast %5 : i32 to vector<8x1xi32>
    %24 = arith.select %22, %23, %19 : vector<8x1xi1>, vector<8x1xi32>
    %25 = arith.cmpi ne, %18, %24 : vector<8x1xi32>
    %26 = arith.extui %25 : vector<8x1xi1> to vector<8x1xi32>
    %c65536_i32 = arith.constant 65536 : i32
    %27 = vector.broadcast %c65536_i32 : i32 to vector<8x1xi32>
    %28 = arith.muli %26, %27 : vector<8x1xi32>
    %29 = arith.addi %18, %28 : vector<8x1xi32>
    %c0_5 = arith.constant 0 : index
    %c0_6 = arith.constant 0 : index
    %30 = vector.load %arg3[%c0_5, %c0_6] : memref<8x1xi32, #tpu.memory_space<vmem>>, vector<8x1xi32>
    tpu.vector_store %arg3[%c0_5, %c0_6], %29 {strides = array<i32>} : memref<8x1xi32, #tpu.memory_space<vmem>>, vector<8x1xi32>,
    return
  }
  func.func @transform_0(%arg0: i32, %arg1: memref<1xi32, #tpu.memory_space<smem>>) -> (i32, i32) {
    %c0_i32 = arith.constant 0 : i32
    %c0_i32_0 = arith.constant 0 : i32
    return %arg0, %c0_i32 : i32, i32
  }
  func.func @transform_1(%arg0: i32, %arg1: memref<1xi32, #tpu.memory_space<smem>>) -> (i32, i32) {
    %c0_i32 = arith.constant 0 : i32
    %c0_i32_0 = arith.constant 0 : i32
    return %arg0, %c0_i32 : i32, i32
  }
}

</mosaic_0001>

<bundles_post_ra>
// kernel: tpu_custom_call.1
= control target key start
LH: loop header
LB: loop body
LE: loop exit
PB: predicated region body
PF: predicated region fallthrough
CT: control target
= control target key end

     0   :  { %8 = vsyncpa [#allocation5], 0  ;;  %s98_s9 = smov [#allocation4]   ;;  %s130_s0 = inlined_call_operand.<no memory space> [shape: s32[1], index: 0, kind: input, shape index: {}]   ;;  %s131_s1 = inlined_call_operand.hbm [shape: bf16[8,32], index: 1, kind: input, shape index: {}]   ;;  %s132_s2 = inlined_call_operand.vmem [shape: s32[8,1], index: 2, kind: output, shape index: {}]  }
   0x1   :  { %s15_s10 = sshll.u32 %s98_s9, 4  ;;  %s74_s13 = scalar_lea.hbm %s131_s1, 64  ;;  %s16_s10 = int_to_ptr.vmem [resolvable:$true] %s15_s10 }
   0x2   :  { %p75_p0 = scmp.ne.s32.totalorder %s131_s1, %s74_s13  ;;  %p78_p1 = scmp.lt.u32.totalorder %s74_s13, %s131_s1 }
   0x4   :  { %p80_p2 = pnand %p78_p1, %p75_p0 }
   0x6   :  { %83 = shalt.err (!%p80_p2)
}
   0x7   :  { %s84_s17 = scalar_lea.vmem %s16_s10, 64  ;;  %p89_p4 = scmp.lt.s32.totalorder %s16_s10, %s16_s10 }
   0x8   :  { %p85_p3 = scmp.ne.s32.totalorder %s16_s10, %s84_s17  ;;  %p90_p5 = scmp.lt.s32.totalorder %s84_s17, %s84_s17 }
   0xa   :  { %p91_p6 = por %p90_p5, %p89_p4 }
   0xc   :  { %p92_p7 = pnand %p91_p6, %p85_p3 }
   0xe   :  { %95 = shalt.err (!%p92_p7)
}
   0xf   :  { %18 = dma.hbm_to_vmem [thread:$0]  %s131_s1, 64, %s16_s10, [#allocation5]  }
  0x10   :  { %96 = dma.done.wait [#allocation5], 64  }
  0x11   :  { %97 = vsyncadd [#allocation5], 4294967232  ;;  %v28_v0 = vld [vmem:[#allocation4] sm:$0xf]  ;;  %vm30_vm0 = vcmask 261120   ;;  %v34_v3 = vlaneseq  ;;  %v99_v23 = vmov 0  }
  0x12   :  { %v29_v1 = vunpack.c.l.bf16 %v28_v0  ;;  %vm65_vm6 = vcmask 7168  }
  0x13   :  { %v35_v4 = vand.u32 127, %v34_v3  ;;  %v57_v18 = vshrl.u32 %v34_v3, 7 }
  0x14   :  { %v31_v2 = vsel %vm30_vm0, %v29_v1, -inf }
  0x15   :  { %32 = vmax.xlane.f32.xlu0 %v31_v2  ;;  %vm58_vm4 = vcmp.eq.s32.totalorder %v57_v18, 0 }
  0xa2   :  { %v33_v5 = vpop.xlane.xlu0 %32 }
  0xa3   :  { %vm36_vm1 = vcmp.eq.f32.partialorder %v29_v1, %v33_v5 }
  0xa4   :  { %v37_v6 = vsel %vm36_vm1, %v35_v4, 32 }
  0xa5   :  { %v38_v7 = vsel %vm30_vm0, %v37_v6, 2147483647 }
  0xa6   :  { %v40_v8 = vshra.s32 %v38_v7, 16  ;;  %v39_v10 = vand.u32 65535, %v38_v7 }
  0xa8   :  { %v42_v9 = vcvt.s32.f32 %v40_v8  ;;  %v41_v12 = vcvt.s32.f32 %v39_v10 }
  0xaa   :  { %43 = vmin.xlane.f32.xlu0 %v42_v9 }
 0x137   :  { %v44_v11 = vpop.xlane.xlu0 %43 }
 0x138   :  { %vm45_vm2 = vcmp.eq.f32.partialorder %v42_v9, %v44_v11  ;;  %v50_v14 = vcvt.f32.s32 %v44_v11 }
 0x139   :  { %v46_v13 = vsel %vm45_vm2, %v41_v12, inf }
 0x13a   :  { %47 = vmin.xlane.f32.xlu1 %v46_v13  ;;  %v51_v16 = vshll.u32 %v50_v14, 16 }
 0x1c7   :  { %v48_v15 = vpop.xlane.xlu1 %47 }
 0x1c8   :  { %v49_v17 = vcvt.f32.s32 %v48_v15 }
 0x1ca   :  { %v52_v19 = vadd.s32 %v51_v16, %v49_v17 }
 0x1cc   :  { %vm53_vm3 = vcmp.lt.s32.totalorder %v52_v19, 31 }
 0x1cd   :  { %v54_v20 = vsel %vm53_vm3, %v52_v19, 31 }
 0x1ce   :  { %v55_v21 = vrot.slane %v54_v20, 7 }
 0x1d0   :  { %v60_v22 = vsel %vm58_vm4, 4294967295, %v55_v21 }
 0x1d1   :  { %vm61_vm5 = vcmp.ne.s32.totalorder %v54_v20, %v60_v22 }
 0x1d2   :  { %v62_v24 = vsel %vm61_vm5, 1, %v99_v23 }
 0x1d3   :  { %v63_v25 = vmul.u32 65536, %v62_v24 }
 0x1d5   :  { %v64_v26 = vadd.s32 %v63_v25, %v54_v20 }
 0x1d7   :  { %66 = vst.msk [vmem:[%s132_s2] sm:$0xff] %vm65_vm6, %v64_v26 }
 0x1d8   :  { %71 = vsyncpa [#allocation5], 1 }

</bundles_post_ra>
